<compile_context>
chip_gen: v7x
topology: tpu7x:2x2x1
jax: 0.10.0
libtpu: 0.0.40
codegen_flags: <defaults>
</compile_context>

<pallas_src>
import jax
import jax.numpy as jnp
from jax.experimental import pallas as pl
from jax.experimental.pallas import tpu as pltpu

NUMBER_OF_CLASSES = 10
P_DROP = 0.4

# Logical widths (PyTorch spec) and lane-padded widths (multiples of 128).
D_IN, D_H1, D_H2, D_H3, D_OUT = 200, 150, 100, 50, NUMBER_OF_CLASSES
P_IN, P_H1, P_H2, P_H3, P_OUT = 256, 256, 128, 128, 128


def _round_up(n, m):
    return ((n + m - 1) // m) * m


def mlp_dropout_kernel(x_ref,
                       w1_ref, b1_ref, w2_ref, b2_ref,
                       w3_ref, b3_ref, w4_ref, b4_ref,
                       m1_ref, m2_ref, m3_ref,
                       o_ref):
    x = x_ref[...]

    # Linear(200,150) + ReLU + Dropout (mask is precomputed {0, 1/(1-p)}).
    h = jnp.dot(x, w1_ref[...], preferred_element_type=jnp.float32) + b1_ref[...]
    h = jnp.maximum(h, 0.0) * m1_ref[...]

    # Linear(150,100) + ReLU + Dropout.
    h = jnp.dot(h, w2_ref[...], preferred_element_type=jnp.float32) + b2_ref[...]
    h = jnp.maximum(h, 0.0) * m2_ref[...]

    # Linear(100,50) + Tanh + Dropout.
    h = jnp.dot(h, w3_ref[...], preferred_element_type=jnp.float32) + b3_ref[...]
    h = jnp.tanh(h) * m3_ref[...]

    # Linear(50, NUMBER_OF_CLASSES) -- written lane-dense into a 128-wide slab.
    h = jnp.dot(h, w4_ref[...], preferred_element_type=jnp.float32) + b4_ref[...]
    o_ref[...] = h.astype(o_ref.dtype)


def dropout_model_forward(x, params, key, *, training=True, block_b=256):
    """x: [B, 200] float32; params: lane-padded (w1,b1,...,w4,b4); key: jax PRNG key.

    Returns [B, NUMBER_OF_CLASSES] float32.
    """
    B = x.shape[0]
    TB = min(block_b, _round_up(B, 8))     # batch tile (sublane-aligned)
    Bp = _round_up(B, TB)                  # padded batch
    grid = (Bp // TB,)

    # Zero-pad input to [Bp, 256]; padded rows/lanes propagate zeros harmlessly.
    x_p = jnp.zeros((Bp, P_IN), jnp.float32).at[:B, :D_IN].set(x)

    # Precomputed dropout masks with the 1/(1-p) survivor scale folded in.
    scale = 1.0 / (1.0 - P_DROP)

    def make_mask(k, width):
        if not training:
            return jnp.ones((Bp, width), jnp.float32)
        keep = jax.random.bernoulli(k, 1.0 - P_DROP, (Bp, width))
        return keep.astype(jnp.float32) * jnp.float32(scale)

    k1, k2, k3 = jax.random.split(key, 3)
    m1 = make_mask(k1, P_H1)
    m2 = make_mask(k2, P_H2)
    m3 = make_mask(k3, P_H3)

    w1, b1, w2, b2, w3, b3, w4, b4 = params

    def batch_spec(width):
        # Tiled along batch; auto double-buffered by the BlockSpec pipeline.
        return pl.BlockSpec((TB, width), lambda i: (i, 0))

    def resident_spec(shape):
        # Same block for every grid step -> stays VMEM-resident.
        return pl.BlockSpec(shape, lambda i, _s=shape: (0,) * len(_s))

    in_specs = [
        batch_spec(P_IN),
        resident_spec(w1.shape), resident_spec(b1.shape),
        resident_spec(w2.shape), resident_spec(b2.shape),
        resident_spec(w3.shape), resident_spec(b3.shape),
        resident_spec(w4.shape), resident_spec(b4.shape),
        batch_spec(P_H1), batch_spec(P_H2), batch_spec(P_H3),
    ]
    out_spec = pl.BlockSpec((TB, P_OUT), lambda i: (i, 0))

    flops = 2 * B * (D_IN * D_H1 + D_H1 * D_H2 + D_H2 * D_H3 + D_H3 * D_OUT)
    bytes_accessed = 4 * (x_p.size
                          + sum(int(p.size) for p in params)
                          + int(m1.size) + int(m2.size) + int(m3.size)
                          + Bp * P_OUT)

    out = pl.pallas_call(
        mlp_dropout_kernel,
        out_shape=jax.ShapeDtypeStruct((Bp, P_OUT), jnp.float32),
        grid=grid,
        in_specs=in_specs,
        out_specs=out_spec,
        compiler_params=pltpu.CompilerParams(
            dimension_semantics=("parallel",)),
        cost_estimate=pl.CostEstimate(
            flops=flops,
            transcendentals=B * D_H3,
            bytes_accessed=bytes_accessed),
    )(x_p, w1, b1, w2, b2, w3, b3, w4, b4, m1, m2, m3)

    return out[:B, :NUMBER_OF_CLASSES]


def init_params(key):
    """PyTorch Linear default init U(-1/sqrt(fan_in), +1/sqrt(fan_in)),
    zero-padded into lane-dense [pad_in, pad_out] / [1, pad_out] buffers."""
    dims = [(D_IN, D_H1, P_IN, P_H1),
            (D_H1, D_H2, P_H1, P_H2),
            (D_H2, D_H3, P_H2, P_H3),
            (D_H3, D_OUT, P_H3, P_OUT)]
    params = []
    for (fan_in, fan_out, pad_in, pad_out) in dims:
        key, kw, kb = jax.random.split(key, 3)
        bound = 1.0 / (fan_in ** 0.5)
        w = jax.random.uniform(kw, (fan_in, fan_out), jnp.float32, -bound, bound)
        b = jax.random.uniform(kb, (1, fan_out), jnp.float32, -bound, bound)
        w_p = jnp.zeros((pad_in, pad_out), jnp.float32).at[:fan_in, :fan_out].set(w)
        b_p = jnp.zeros((1, pad_out), jnp.float32).at[:, :fan_out].set(b)
        params += [w_p, b_p]
    return tuple(params)


if __name__ == "__main__":
    key = jax.random.PRNGKey(0)
    kx, kp, kd = jax.random.split(key, 3)

    B = 16
    x = jax.random.normal(kx, (B, D_IN), jnp.float32)
    params = init_params(kp)

    # Training mode (dropout active), batch tile of 8 -> grid=(2,).
    out = dropout_model_forward(x, params, kd, training=True, block_b=8)
    out = jax.block_until_ready(out)
    assert out.shape == (B, NUMBER_OF_CLASSES)
    assert bool(jnp.all(jnp.isfinite(out)))

    # Eval mode (dropout off) reuses the same kernel with all-ones masks.
    out_eval = dropout_model_forward(x, params, kd, training=False, block_b=8)
    out_eval = jax.block_until_ready(out_eval)
    assert out_eval.shape == (B, NUMBER_OF_CLASSES)
    assert bool(jnp.all(jnp.isfinite(out_eval)))

    print("KERNEL_OK")
</pallas_src>

<mosaic_0001>
module attributes {stable_mosaic.version = 11 : i64} {
  func.func @mlp_dropout_kernel(%arg0: i32, %arg1: memref<8x256xf32, #tpu.memory_space<vmem>>, %arg2: memref<256x256xf32, #tpu.memory_space<vmem>>, %arg3: memref<1x256xf32, #tpu.memory_space<vmem>>, %arg4: memref<256x128xf32, #tpu.memory_space<vmem>>, %arg5: memref<1x128xf32, #tpu.memory_space<vmem>>, %arg6: memref<128x128xf32, #tpu.memory_space<vmem>>, %arg7: memref<1x128xf32, #tpu.memory_space<vmem>>, %arg8: memref<128x128xf32, #tpu.memory_space<vmem>>, %arg9: memref<1x128xf32, #tpu.memory_space<vmem>>, %arg10: memref<8x256xf32, #tpu.memory_space<vmem>>, %arg11: memref<8x128xf32, #tpu.memory_space<vmem>>, %arg12: memref<8x128xf32, #tpu.memory_space<vmem>>, %arg13: memref<8x128xf32, #tpu.memory_space<vmem>>) attributes {dimension_semantics = [#tpu.dimension_semantics<parallel>], iteration_bounds = array<i64: 2>, scalar_prefetch = 0 : i64, scratch_operands = 0 : i64, tpu.core_type = #tpu.core_type<tc>, window_params = [{transform_indices = @transform_0, window_bounds = array<i64: 8, 256>}, {pipeline_mode = #tpu.pipeline_mode<synchronous>, transform_indices = @transform_1, window_bounds = array<i64: 256, 256>}, {pipeline_mode = #tpu.pipeline_mode<synchronous>, transform_indices = @transform_2, window_bounds = array<i64: 1, 256>}, {pipeline_mode = #tpu.pipeline_mode<synchronous>, transform_indices = @transform_3, window_bounds = array<i64: 256, 128>}, {pipeline_mode = #tpu.pipeline_mode<synchronous>, transform_indices = @transform_4, window_bounds = array<i64: 1, 128>}, {pipeline_mode = #tpu.pipeline_mode<synchronous>, transform_indices = @transform_5, window_bounds = array<i64: 128, 128>}, {pipeline_mode = #tpu.pipeline_mode<synchronous>, transform_indices = @transform_6, window_bounds = array<i64: 1, 128>}, {pipeline_mode = #tpu.pipeline_mode<synchronous>, transform_indices = @transform_7, window_bounds = array<i64: 128, 128>}, {pipeline_mode = #tpu.pipeline_mode<synchronous>, transform_indices = @transform_8, window_bounds = array<i64: 1, 128>}, {transform_indices = @transform_9, window_bounds = array<i64: 8, 256>}, {transform_indices = @transform_10, window_bounds = array<i64: 8, 128>}, {transform_indices = @transform_11, window_bounds = array<i64: 8, 128>}, {transform_indices = @transform_12, window_bounds = array<i64: 8, 128>}]} {
    %c0 = arith.constant 0 : index
    %c0_0 = arith.constant 0 : index
    %0 = vector.load %arg1[%c0, %c0_0] : memref<8x256xf32, #tpu.memory_space<vmem>>, vector<8x256xf32>
    %c0_1 = arith.constant 0 : index
    %c0_2 = arith.constant 0 : index
    %1 = vector.load %arg2[%c0_1, %c0_2] : memref<256x256xf32, #tpu.memory_space<vmem>>, vector<256x256xf32>
    %cst = arith.constant dense<0.000000e+00> : vector<8x256xf32>
    %2 = tpu.matmul %0, %1, %cst {dimension_numbers = #tpu.dot_dimension_numbers<[1], [0], [0], [1], [0, 0, 1, 1], [], []>} : vector<8x256xf32>, vector<256x256xf32>, vector<8x256xf32> -> vector<8x256xf32>
    %c0_3 = arith.constant 0 : index
    %c0_4 = arith.constant 0 : index
    %3 = vector.load %arg3[%c0_3, %c0_4] : memref<1x256xf32, #tpu.memory_space<vmem>>, vector<1x256xf32>
    %4 = vector.broadcast %3 : vector<1x256xf32> to vector<8x256xf32>
    %5 = arith.addf %2, %4 : vector<8x256xf32>
    %cst_5 = arith.constant 0.000000e+00 : f32
    %6 = vector.broadcast %cst_5 : f32 to vector<8x256xf32>
    %7 = arith.maximumf %5, %6 : vector<8x256xf32>
    %c0_6 = arith.constant 0 : index
    %c0_7 = arith.constant 0 : index
    %8 = vector.load %arg10[%c0_6, %c0_7] : memref<8x256xf32, #tpu.memory_space<vmem>>, vector<8x256xf32>
    %9 = arith.mulf %7, %8 : vector<8x256xf32>
    %c0_8 = arith.constant 0 : index
    %c0_9 = arith.constant 0 : index
    %10 = vector.load %arg4[%c0_8, %c0_9] : memref<256x128xf32, #tpu.memory_space<vmem>>, vector<256x128xf32>
    %cst_10 = arith.constant dense<0.000000e+00> : vector<8x128xf32>
    %11 = tpu.matmul %9, %10, %cst_10 {dimension_numbers = #tpu.dot_dimension_numbers<[1], [0], [0], [1], [0, 0, 1, 1], [], []>} : vector<8x256xf32>, vector<256x128xf32>, vector<8x128xf32> -> vector<8x128xf32>
    %c0_11 = arith.constant 0 : index
    %c0_12 = arith.constant 0 : index
    %12 = vector.load %arg5[%c0_11, %c0_12] : memref<1x128xf32, #tpu.memory_space<vmem>>, vector<1x128xf32>
    %13 = vector.broadcast %12 : vector<1x128xf32> to vector<8x128xf32>
    %14 = arith.addf %11, %13 : vector<8x128xf32>
    %cst_13 = arith.constant 0.000000e+00 : f32
    %15 = vector.broadcast %cst_13 : f32 to vector<8x128xf32>
    %16 = arith.maximumf %14, %15 : vector<8x128xf32>
    %c0_14 = arith.constant 0 : index
    %c0_15 = arith.constant 0 : index
    %17 = vector.load %arg11[%c0_14, %c0_15] : memref<8x128xf32, #tpu.memory_space<vmem>>, vector<8x128xf32>
    %18 = arith.mulf %16, %17 : vector<8x128xf32>
    %c0_16 = arith.constant 0 : index
    %c0_17 = arith.constant 0 : index
    %19 = vector.load %arg6[%c0_16, %c0_17] : memref<128x128xf32, #tpu.memory_space<vmem>>, vector<128x128xf32>
    %cst_18 = arith.constant dense<0.000000e+00> : vector<8x128xf32>
    %20 = tpu.matmul %18, %19, %cst_18 {dimension_numbers = #tpu.dot_dimension_numbers<[1], [0], [0], [1], [0, 0, 1, 1], [], []>} : vector<8x128xf32>, vector<128x128xf32>, vector<8x128xf32> -> vector<8x128xf32>
    %c0_19 = arith.constant 0 : index
    %c0_20 = arith.constant 0 : index
    %21 = vector.load %arg7[%c0_19, %c0_20] : memref<1x128xf32, #tpu.memory_space<vmem>>, vector<1x128xf32>
    %22 = vector.broadcast %21 : vector<1x128xf32> to vector<8x128xf32>
    %23 = arith.addf %20, %22 : vector<8x128xf32>
    %24 = math.tanh %23 : vector<8x128xf32>
    %c0_21 = arith.constant 0 : index
    %c0_22 = arith.constant 0 : index
    %25 = vector.load %arg12[%c0_21, %c0_22] : memref<8x128xf32, #tpu.memory_space<vmem>>, vector<8x128xf32>
    %26 = arith.mulf %24, %25 : vector<8x128xf32>
    %c0_23 = arith.constant 0 : index
    %c0_24 = arith.constant 0 : index
    %27 = vector.load %arg8[%c0_23, %c0_24] : memref<128x128xf32, #tpu.memory_space<vmem>>, vector<128x128xf32>
    %cst_25 = arith.constant dense<0.000000e+00> : vector<8x128xf32>
    %28 = tpu.matmul %26, %27, %cst_25 {dimension_numbers = #tpu.dot_dimension_numbers<[1], [0], [0], [1], [0, 0, 1, 1], [], []>} : vector<8x128xf32>, vector<128x128xf32>, vector<8x128xf32> -> vector<8x128xf32>
    %c0_26 = arith.constant 0 : index
    %c0_27 = arith.constant 0 : index
    %29 = vector.load %arg9[%c0_26, %c0_27] : memref<1x128xf32, #tpu.memory_space<vmem>>, vector<1x128xf32>
    %30 = vector.broadcast %29 : vector<1x128xf32> to vector<8x128xf32>
    %31 = arith.addf %28, %30 : vector<8x128xf32>
    %c0_28 = arith.constant 0 : index
    %c0_29 = arith.constant 0 : index
    %32 = vector.load %arg13[%c0_28, %c0_29] : memref<8x128xf32, #tpu.memory_space<vmem>>, vector<8x128xf32>
    tpu.vector_store %arg13[%c0_28, %c0_29], %31 {strides = array<i32>} : memref<8x128xf32, #tpu.memory_space<vmem>>, vector<8x128xf32>,
    return
  }
  func.func @transform_0(%arg0: i32) -> (i32, i32) {
    %c0_i32 = arith.constant 0 : i32
    %c0_i32_0 = arith.constant 0 : i32
    return %arg0, %c0_i32 : i32, i32
  }
  func.func @transform_1(%arg0: i32) -> (i32, i32) {
    %c0_i32 = arith.constant 0 : i32
    %c0_i32_0 = arith.constant 0 : i32
    %c0_i32_1 = arith.constant 0 : i32
    return %c0_i32, %c0_i32_0 : i32, i32
  }
  func.func @transform_2(%arg0: i32) -> (i32, i32) {
    %c0_i32 = arith.constant 0 : i32
    %c0_i32_0 = arith.constant 0 : i32
    %c0_i32_1 = arith.constant 0 : i32
    return %c0_i32, %c0_i32_0 : i32, i32
  }
  func.func @transform_3(%arg0: i32) -> (i32, i32) {
    %c0_i32 = arith.constant 0 : i32
    %c0_i32_0 = arith.constant 0 : i32
    %c0_i32_1 = arith.constant 0 : i32
    return %c0_i32, %c0_i32_0 : i32, i32
  }
  func.func @transform_4(%arg0: i32) -> (i32, i32) {
    %c0_i32 = arith.constant 0 : i32
    %c0_i32_0 = arith.constant 0 : i32
    %c0_i32_1 = arith.constant 0 : i32
    return %c0_i32, %c0_i32_0 : i32, i32
  }
  func.func @transform_5(%arg0: i32) -> (i32, i32) {
    %c0_i32 = arith.constant 0 : i32
    %c0_i32_0 = arith.constant 0 : i32
    %c0_i32_1 = arith.constant 0 : i32
    return %c0_i32, %c0_i32_0 : i32, i32
  }
  func.func @transform_6(%arg0: i32) -> (i32, i32) {
    %c0_i32 = arith.constant 0 : i32
    %c0_i32_0 = arith.constant 0 : i32
    %c0_i32_1 = arith.constant 0 : i32
    return %c0_i32, %c0_i32_0 : i32, i32
  }
  func.func @transform_7(%arg0: i32) -> (i32, i32) {
    %c0_i32 = arith.constant 0 : i32
    %c0_i32_0 = arith.constant 0 : i32
    %c0_i32_1 = arith.constant 0 : i32
    return %c0_i32, %c0_i32_0 : i32, i32
  }
  func.func @transform_8(%arg0: i32) -> (i32, i32) {
    %c0_i32 = arith.constant 0 : i32
    %c0_i32_0 = arith.constant 0 : i32
    %c0_i32_1 = arith.constant 0 : i32
    return %c0_i32, %c0_i32_0 : i32, i32
  }
  func.func @transform_9(%arg0: i32) -> (i32, i32) {
    %c0_i32 = arith.constant 0 : i32
    %c0_i32_0 = arith.constant 0 : i32
    return %arg0, %c0_i32 : i32, i32
  }
  func.func @transform_10(%arg0: i32) -> (i32, i32) {
    %c0_i32 = arith.constant 0 : i32
    %c0_i32_0 = arith.constant 0 : i32
    return %arg0, %c0_i32 : i32, i32
  }
  func.func @transform_11(%arg0: i32) -> (i32, i32) {
    %c0_i32 = arith.constant 0 : i32
    %c0_i32_0 = arith.constant 0 : i32
    return %arg0, %c0_i32 : i32, i32
  }
  func.func @transform_12(%arg0: i32) -> (i32, i32) {
    %c0_i32 = arith.constant 0 : i32
    %c0_i32_0 = arith.constant 0 : i32
    return %arg0, %c0_i32 : i32, i32
  }
}

</mosaic_0001>

<bundles_post_ra>
// kernel: tpu_custom_call.1
= control target key start
LH: loop header
LB: loop body
LE: loop exit
PB: predicated region body
PF: predicated region fallthrough
CT: control target
= control target key end

     0   :  { %s2636_s0 = inlined_call_operand.hbm [shape: f32[16,256], index: 0, kind: input, shape index: {}]   ;;  %s2637_s1 = inlined_call_operand.hbm [shape: f32[256,256], index: 1, kind: input, shape index: {}]   ;;  %s2638_s2 = inlined_call_operand.vmem [shape: f32[1,256], index: 2, kind: input, shape index: {}]   ;;  %s2639_s3 = inlined_call_operand.hbm [shape: f32[256,128], index: 3, kind: input, shape index: {}]   ;;  %s2640_s4 = inlined_call_operand.hbm [shape: f32[1,128], index: 4, kind: input, shape index: {}]   ;;  %s2641_s5 = inlined_call_operand.hbm [shape: f32[128,128], index: 5, kind: input, shape index: {}]   ;;  %s2642_s6 = inlined_call_operand.hbm [shape: f32[1,128], index: 6, kind: input, shape index: {}]   ;;  %s2643_s7 = inlined_call_operand.hbm [shape: f32[128,128], index: 7, kind: input, shape index: {}]   ;;  %s2644_s8 = inlined_call_operand.hbm [shape: f32[1,128], index: 8, kind: input, shape index: {}]   ;;  %s2645_s9 = inlined_call_operand.vmem [shape: f32[16,256], index: 9, kind: input, shape index: {}]   ;;  %s2646_s10 = inlined_call_operand.hbm [shape: f32[16,128], index: 10, kind: input, shape index: {}]   ;;  %s2647_s11 = inlined_call_operand.hbm [shape: f32[16,128], index: 11, kind: input, shape index: {}]   ;;  %s2648_s12 = inlined_call_operand.hbm [shape: f32[16,128], index: 12, kind: output, shape index: {}]  }
   0x1   :  { %2676 = sst [smem:[#allocation35_spill]] %s2636_s0 }
   0x2   :  { %2677 = sst [smem:[#allocation36_spill]] %s2637_s1 }
   0x3   :  { %2678 = sst [smem:[#allocation37_spill]] %s2638_s2 }
   0x4   :  { %2679 = sst [smem:[#allocation38_spill]] %s2639_s3 }
   0x5   :  { %2680 = sst [smem:[#allocation39_spill]] %s2645_s9 }
   0x6   :  { %2681 = sst [smem:[#allocation40_spill]] %s2648_s12 }
   0x7   :  { %17 = vsyncpa [#allocation3], 0 }
   0x8   :  { %19 = vsyncpa [#allocation3 + $0x1], 0 }
   0x9   :  { %20 = vsyncpa [#allocation6], 0 }
   0xa   :  { %21 = vsyncpa [#allocation9], 0 }
   0xb   :  { %22 = vsyncpa [#allocation12], 0 }
   0xc   :  { %23 = vsyncpa [#allocation15], 0 }
   0xd   :  { %24 = vsyncpa [#allocation4], 0 }
   0xe   :  { %26 = vsyncpa [#allocation4 + $0x1], 0  ;;  %s2190_s21 = smov 0   ;;  %s2192_s22 = smov 0  }
   0xf   :  { %s2194_s23 = smov 0   ;;  %s2196_s24 = smov 0  }
  0x10 LB: > { %2682 = sst [smem:[#allocation26_spill]] %s2093_s21  ;;  %s2211_s25 = sadd.s32 4294967295, %s2105_s24   ;;  %s2105_s24 = sphi %s2196_s24, %s2734_s24   ;;  %s2101_s23 = sphi %s2194_s23, %s2737_s23   ;;  %s2097_s22 = sphi %s2192_s22, %s2736_s22   ;;  %s2093_s21 = sphi %s2190_s21, %s2735_s21  }
  0x11   : > { %2683 = sst [smem:[#allocation27_spill]] %s2097_s22  ;;  %s1274_s26 = sadd.s32 4294967294, %s2105_s24  }
  0x12   : > { %2684 = sst [smem:[#allocation28_spill]] %s2101_s23  ;;  %s2215_s27 = sadd.s32 1, %s2105_s24  }
  0x13   : > { %2685 = sst [smem:[#allocation29_spill]] %s2211_s25  ;;  %s39_s28 = sadd.s32 1, %s2101_s23 }
  0x14   : > { %2686 = sst [smem:[#allocation30_spill]] %s2215_s27  ;;  %s36_s29 = ssub.s32 %s2105_s24, %s2215_s27 }
  0x15   : > { %p46_p0 = scmp.ne.s32.totalorder %s2101_s23, %s2097_s22  ;;  %p37_p1 = scmp.eq.s32.totalorder %s36_s29, 0 }
  0x16   : > { %p47_p2 = scmp.eq.s32.totalorder %s2105_s24, 0  ;;  %p52_p3 = scmp.ne.s32.totalorder %s2097_s22, %s2093_s21 }
  0x17   : > { %p2649_p4 = scmp.eq.s32.totalorder %s2211_s25, 0  ;;  %p322_p7 = scmp.eq.s32.totalorder %s2211_s25, 1 }
  0x18   : > { %s2227_s30 = scalar_select %p37_p1, %s2101_s23, %s39_s28  }
  0x19   : > { %p2229_p5 = por %p47_p2, %p46_p0  ;;  %p2235_p6 = por %p2649_p4, %p52_p3 }
  0x1a   : > { %2687 = sst [smem:[#allocation31_spill]] %s2227_s30  ;;  %p328_p8 = scmp.eq.s32.totalorder %s1274_s26, 1 }
  0x1b   : > { %s2689_s14 = scalar_select %p2235_p6, 1, 0 }
  0x1c   : > { %p1275_p9 = scmp.ge.s32.totalorder %s2105_s24, 1  ;;  %p335_p10 = scmp.lt.s32.totalorder %s2105_s24, 3 }
  0x1d   : > { %2690 = sst [smem:[#allocation32_spill]] %s2689_s14  ;;  %p2242_p11 = por %p322_p7, %p46_p0 }
  0x1e   : > { %p2246_p12 = por %p328_p8, %p52_p3  ;;  %p2250_p13 = pnand %p1275_p9, %p335_p10 }
  0x1f   : > { %s2691_s15 = scalar_select %p2242_p11, 1, 0 }
  0x20   : > { %s2693_s16 = scalar_select %p2246_p12, 1, 0 }
  0x21   : > { %2692 = sst [smem:[#allocation33_spill]] %s2691_s15  ;;  %p1676_p2 = scmp.lt.s32.totalorder %s2105_s24, 2 }
  0x22   : > { %2694 = sst [smem:[#allocation34_spill]] %s2693_s16  ;;  %p1633_p4 = pneg %p2250_p13 }
  0x23   : > { %s2695_s17 = scalar_select %p2250_p13, 1, 0 }
  0x24   : > { %s436_s18 = sand.u32 1, %s2105_s24   ;;  %s438_s19 = sand.u32 1, %s2101_s23  }
  0x25   : > { %p2696_p6 = scmp.eq.s32.totalorder %s2211_s25, 0  ;;  %s1284_s26 = sshll.u32 %s438_s19, 4 }
  0x26   : > { %s1312_s28 = sshll.u32 %s2105_s24, 8  ;;  %s2698_s0 = sld [smem:[#allocation35_spill]] }
  0x27   : > { %p2262_p0 = pnand %p1633_p4, %p2696_p6  ;;  %s440_s16 = scalar_lea.vmem [#allocation2], %s1284_s26 }
  0x28   : > { %s448_s21 = sshll.u32 %s440_s16, 4  ;;  %p2274_p3 = pnand %p1676_p2, %p2229_p5  ;;  %s2278_s21 = int_to_ptr.vmem [resolvable:$true] %s448_s21 }
  0x29   : > { %s2697_s20 = scalar_select %p2262_p0, 1, 0 }
  0x2a   : > { %s2699_s23 = scalar_select %p2274_p3, 1, 0 }
  0x2b   : > { %s2280_s12 = sshll.u32 %s438_s19, 3  ;;  %s2282_s15 = scalar_lea.sflag [#allocation3], %s436_s18 }
  0x2c   : > { %s2270_s27 = scalar_lea.hbm %s2698_s0, %s1312_s28  ;;  %p2288_p6 = pneg %p2274_p3 }
  0x2d   : > { %s1733_s30 = scalar_lea.hbm %s2270_s27, 256  ;;  %s1738_s26 = scalar_lea.hbm %s2698_s0, 512 }
  0x2e   : > { %p1734_p4 = scmp.ne.s32.totalorder %s2270_s27, %s1733_s30  ;;  %p1739_p8 = scmp.lt.u32.totalorder %s2270_s27, %s2698_s0 }
  0x2f   : > { %s2700_s28 = scalar_select %p2288_p6, 1, 0 }
  0x30   : > { %p1736_p5 = pnand %p2288_p6, %p1734_p4  ;;  %p1740_p9 = scmp.lt.u32.totalorder %s1738_s26, %s1733_s30 }
  0x31   : > { %p1742_p2 = scmp.lt.u32.totalorder %s1733_s30, %s2270_s27 }
  0x32   : > { %p1737_p7 = pneg %p1736_p5  ;;  %p1741_p10 = por %p1740_p9, %p1739_p8 }
  0x34   : > { %p1743_p1 = por %p1742_p2, %p1741_p10 }
  0x36   : > { %p1744_p12 = pnand %p1743_p1, %p1737_p7 }
  0x38   : > { %1747 = shalt.err (!%p1744_p12)
}
  0x39   : > { %s1748_s18 = scalar_lea.vmem %s2278_s21, 256  ;;  %s2107_s13 = smov [#allocation2]  }
  0x3a   : > { %p1749_p4 = scmp.ne.s32.totalorder %s2278_s21, %s1748_s18  ;;  %s1753_s16 = sshll.u32 %s2107_s13, 4  ;;  %s1754_s16 = int_to_ptr.vmem [resolvable:$false] %s1753_s16 }
  0x3b   : > { %s1755_s29 = scalar_lea.vmem %s1754_s16, 512  ;;  %p1756_p13 = scmp.lt.s32.totalorder %s2278_s21, %s1754_s16 }
  0x3c   : > { %p1751_p5 = pnand %p1749_p4, %p2288_p6  ;;  %p1757_p0 = scmp.lt.s32.totalorder %s1755_s29, %s1748_s18 }
  0x3e   : > { %p1752_p11 = pneg %p1751_p5  ;;  %p1758_p8 = por %p1757_p0, %p1756_p13 }
  0x40   : > { %p1759_p9 = pnand %p1758_p8, %p1752_p11 }
  0x42   : > { %1762 = shalt.err (!%p1759_p9)
}
  0x43   : > { %1658 = dma.hbm_to_vmem [thread:$0]  (!%p2274_p3), %s2270_s27, 256, %s2278_s21, %s2282_s15  }
  0x44   : > { %s2108_s30 = smov [#allocation5]   ;;  %s2701_s1 = sld [smem:[#allocation36_spill]] }
  0x45   : > { %s347_s26 = sshll.u32 %s2108_s30, 4  ;;  %p2702_p11 = scmp.ne.s32.totalorder %s2697_s20, 0  ;;  %s348_s26 = int_to_ptr.vmem [resolvable:$true] %s347_s26 }
  0x47   : > { %p2320_p13 = pneg %p2702_p11 }
  0x49   : > { %s2703_s18 = scalar_select %p2320_p13, 1, 0 }
  0x4a   : > { %s1763_s13 = scalar_lea.hbm %s2701_s1, 8192 }
  0x4b   : > { %p1764_p12 = scmp.ne.s32.totalorder %s2701_s1, %s1763_s13  ;;  %p1770_p7 = scmp.lt.u32.totalorder %s1763_s13, %s2701_s1 }
  0x4d   : > { %p1766_p1 = pnand %p2320_p13, %p1764_p12 }
  0x4f   : > { %p1767_p0 = pneg %p1766_p1 }
  0x51   : > { %p1772_p10 = pnand %p1770_p7, %p1767_p0 }
  0x53   : > { %1775 = shalt.err (!%p1772_p10)
}
  0x54   : > { %s1776_s0 = scalar_lea.vmem %s348_s26, 8192  ;;  %p1784_p8 = scmp.lt.s32.totalorder %s348_s26, %s348_s26 }
  0x55   : > { %p1777_p2 = scmp.ne.s32.totalorder %s348_s26, %s1776_s0  ;;  %p1785_p9 = scmp.lt.s32.totalorder %s1776_s0, %s1776_s0 }
  0x57   : > { %p1779_p4 = pnand %p1777_p2, %p2320_p13  ;;  %p1786_p3 = por %p1785_p9, %p1784_p8 }
  0x59   : > { %p1780_p5 = pneg %p1779_p4 }
  0x5b   : > { %p1787_p6 = pnand %p1786_p3, %p1780_p5 }
  0x5d   : > { %1790 = shalt.err (!%p1787_p6)
}
  0x5e   : > { %s2109_s9 = smov 256   ;;  %s2110_s29 = smov 16  }
  0x5f   : > { %1636 = dma.hbm_to_vmem [thread:$0]  (!%p2702_p11), %s2701_s1, 8192, %s348_s26, [#allocation6], %s2109_s9, %s2109_s9, %s2110_s29  }
  0x60   : > { %s2111_s13 = smov [#allocation8]   ;;  %s2112_s21 = smov [#allocation11]  }
  0x61   : > { %s377_s16 = sshll.u32 %s2111_s13, 4  ;;  %s401_s27 = sshll.u32 %s2112_s21, 4  ;;  %s378_s16 = int_to_ptr.vmem [resolvable:$true] %s377_s16  ;;  %s2336_s27 = int_to_ptr.vmem [resolvable:$true] %s401_s27 }
  0x62   : > { %s1791_s14 = scalar_lea.hbm %s2640_s4, 16 }
  0x63   : > { %p1792_p3 = scmp.ne.s32.totalorder %s2640_s4, %s1791_s14  ;;  %p1798_p1 = scmp.lt.u32.totalorder %s1791_s14, %s2640_s4 }
  0x65   : > { %p1794_p6 = pnand %p1792_p3, %p2320_p13 }
  0x67   : > { %p1795_p12 = pneg %p1794_p6 }
  0x69   : > { %p1800_p0 = pnand %p1798_p1, %p1795_p12 }
  0x6b   : > { %1803 = shalt.err (!%p1800_p0)
}
  0x6c   : > { %s1804_s9 = scalar_lea.vmem %s378_s16, 16  ;;  %s1811_s2 = scalar_lea.vmem %s378_s16, 32 }
  0x6d   : > { %p1805_p7 = scmp.ne.s32.totalorder %s378_s16, %s1804_s9  ;;  %p1812_p4 = scmp.lt.s32.totalorder %s378_s16, %s378_s16 }
  0x6e   : > { %p1813_p5 = scmp.lt.s32.totalorder %s1811_s2, %s1804_s9 }
  0x6f   : > { %p1807_p10 = pnand %p1805_p7, %p2320_p13 }
  0x70   : > { %p1814_p8 = por %p1813_p5, %p1812_p4 }
  0x71   : > { %p1808_p2 = pneg %p1807_p10 }
  0x73   : > { %p1815_p9 = pnand %p1814_p8, %p1808_p2 }
  0x75   : > { %1818 = shalt.err (!%p1815_p9)
}
  0x76   : > { %1642 = dma.hbm_to_vmem [thread:$0]  (!%p2702_p11), %s2640_s4, 16, %s378_s16, [#allocation9]  }
  0x77   : > { %s1819_s19 = scalar_lea.hbm %s2642_s6, 16 }
  0x78   : > { %p1820_p3 = scmp.ne.s32.totalorder %s2642_s6, %s1819_s19  ;;  %p1826_p1 = scmp.lt.u32.totalorder %s1819_s19, %s2642_s6 }
  0x7a   : > { %p1822_p6 = pnand %p1820_p3, %p2320_p13 }
  0x7c   : > { %p1823_p12 = pneg %p1822_p6 }
  0x7e   : > { %p1828_p0 = pnand %p1826_p1, %p1823_p12 }
  0x80   : > { %1831 = shalt.err (!%p1828_p0)
}
  0x81   : > { %s1832_s16 = scalar_lea.vmem %s2336_s27, 16  ;;  %s1839_s26 = scalar_lea.vmem %s2336_s27, 32 }
  0x82   : > { %p1833_p7 = scmp.ne.s32.totalorder %s2336_s27, %s1832_s16  ;;  %p1840_p4 = scmp.lt.s32.totalorder %s2336_s27, %s2336_s27 }
  0x83   : > { %p1841_p5 = scmp.lt.s32.totalorder %s1839_s26, %s1832_s16 }
  0x84   : > { %p1835_p10 = pnand %p1833_p7, %p2320_p13 }
  0x85   : > { %p1842_p8 = por %p1841_p5, %p1840_p4 }
  0x86   : > { %p1836_p2 = pneg %p1835_p10 }
  0x88   : > { %p1843_p9 = pnand %p1842_p8, %p1836_p2 }
  0x8a   : > { %1846 = shalt.err (!%p1843_p9)
}
  0x8b   : > { %1648 = dma.hbm_to_vmem [thread:$0]  (!%p2702_p11), %s2642_s6, 16, %s2336_s27, [#allocation12]  }
  0x8c   : > { %s2674_s22 = sshll.u32 %s2105_s24, 7  ;;  %s467_s19 = scalar_lea.vmem [#allocation16], %s2280_s12 }
  0x8d   : > { %s2386_s29 = scalar_lea.hbm %s2646_s10, %s2674_s22  ;;  %s474_s13 = sshll.u32 %s467_s19, 4  ;;  %s475_s13 = int_to_ptr.vmem [resolvable:$true] %s474_s13 }
  0x8e   : > { %s1847_s21 = scalar_lea.hbm %s2386_s29, 128  ;;  %p2704_p6 = scmp.ne.s32.totalorder %s2700_s28, 0 }
  0x8f   : > { %p1848_p3 = scmp.ne.s32.totalorder %s2386_s29, %s1847_s21  ;;  %s1852_s30 = scalar_lea.hbm %s2646_s10, 256 }
  0x90   : > { %p1853_p0 = scmp.lt.u32.totalorder %s2386_s29, %s2646_s10  ;;  %p1854_p7 = scmp.lt.u32.totalorder %s1852_s30, %s1847_s21 }
  0x91   : > { %p1850_p12 = pnand %p1848_p3, %p2704_p6  ;;  %p1856_p2 = scmp.lt.u32.totalorder %s1847_s21, %s2386_s29 }
  0x92   : > { %p1855_p10 = por %p1854_p7, %p1853_p0 }
  0x93   : > { %p1851_p1 = pneg %p1850_p12 }
  0x94   : > { %p1857_p4 = por %p1856_p2, %p1855_p10 }
  0x96   : > { %p1858_p5 = pnand %p1857_p4, %p1851_p1 }
  0x98   : > { %1861 = shalt.err (!%p1858_p5)
}
  0x99   : > { %s1862_s9 = scalar_lea.vmem %s475_s13, 128  ;;  %s2113_s2 = smov [#allocation16]  }
  0x9a   : > { %p1863_p8 = scmp.ne.s32.totalorder %s475_s13, %s1862_s9  ;;  %s1867_s25 = sshll.u32 %s2113_s2, 4  ;;  %s1868_s25 = int_to_ptr.vmem [resolvable:$false] %s1867_s25 }
  0x9b   : > { %s1869_s14 = scalar_lea.vmem %s1868_s25, 256  ;;  %p1870_p12 = scmp.lt.s32.totalorder %s475_s13, %s1868_s25 }
  0x9c   : > { %p1865_p9 = pnand %p1863_p8, %p2704_p6  ;;  %p1871_p11 = scmp.lt.s32.totalorder %s1869_s14, %s1862_s9 }
  0x9e   : > { %p1866_p3 = pneg %p1865_p9  ;;  %p1872_p13 = por %p1871_p11, %p1870_p12 }
  0xa0   : > { %p1873_p0 = pnand %p1872_p13, %p1866_p3 }
  0xa2   : > { %1876 = shalt.err (!%p1873_p0)
}
  0xa3   : > { %p2705_p7 = scmp.ne.s32.totalorder %s2699_s23, 0  ;;  %s2114_s19 = smov [#allocation7]  }
  0xa4   : > { %s363_s21 = sshll.u32 %s2114_s19, 4  ;;  %s2706_s3 = sld [smem:[#allocation38_spill]]  ;;  %s364_s21 = int_to_ptr.vmem [resolvable:$true] %s363_s21 }
  0xa5   : > { %1661 = dma.hbm_to_vmem [thread:$0]  (!%p2705_p7), %s2386_s29, 128, %s475_s13, %s2282_s15  }
  0xa6   : > { %p2707_p11 = scmp.ne.s32.totalorder %s2703_s18, 0 }
  0xaa   : > { %s1877_s30 = scalar_lea.hbm %s2706_s3, 4096 }
  0xab   : > { %p1878_p1 = scmp.ne.s32.totalorder %s2706_s3, %s1877_s30  ;;  %p1884_p2 = scmp.lt.u32.totalorder %s1877_s30, %s2706_s3 }
  0xad   : > { %p1880_p13 = pnand %p1878_p1, %p2707_p11 }
  0xaf   : > { %p1881_p10 = pneg %p1880_p13 }
  0xb1   : > { %p1886_p4 = pnand %p1884_p2, %p1881_p10 }
  0xb3   : > { %1889 = shalt.err (!%p1886_p4)
}
  0xb4   : > { %s1890_s29 = scalar_lea.vmem %s364_s21, 4096  ;;  %p1898_p3 = scmp.lt.s32.totalorder %s364_s21, %s364_s21 }
  0xb5   : > { %p1891_p5 = scmp.ne.s32.totalorder %s364_s21, %s1890_s29  ;;  %p1899_p12 = scmp.lt.s32.totalorder %s1890_s29, %s1890_s29 }
  0xb7   : > { %p1893_p8 = pnand %p1891_p5, %p2707_p11  ;;  %p1900_p0 = por %p1899_p12, %p1898_p3 }
  0xb9   : > { %p1894_p9 = pneg %p1893_p8 }
  0xbb   : > { %p1901_p7 = pnand %p1900_p0, %p1894_p9 }
  0xbd   : > { %1904 = shalt.err (!%p1901_p7)
}
  0xbe   : > { %s2115_s13 = smov 128   ;;  %s2116_s25 = smov 8  }
  0xbf   : > { %p2708_p1 = scmp.ne.s32.totalorder %s2697_s20, 0  ;;  %s2117_s27 = smov [#allocation10]  }
  0xc0   : > { %s387_s0 = sshll.u32 %s2117_s27, 4  ;;  %s2118_s30 = smov [#allocation13]   ;;  %s388_s0 = int_to_ptr.vmem [resolvable:$true] %s387_s0 }
  0xc1   : > { %1639 = dma.hbm_to_vmem [thread:$0]  (!%p2708_p1), %s2706_s3, 4096, %s364_s21, [#allocation6], %s2115_s13, %s2115_s13, %s2116_s25  }
  0xc2   : > { %s411_s16 = sshll.u32 %s2118_s30, 4  ;;  %s1905_s2 = scalar_lea.hbm %s2641_s5, 2048  ;;  %s2428_s16 = int_to_ptr.vmem [resolvable:$true] %s411_s16 }
  0xc3   : > { %p1906_p7 = scmp.ne.s32.totalorder %s2641_s5, %s1905_s2  ;;  %p1912_p2 = scmp.lt.u32.totalorder %s1905_s2, %s2641_s5 }
  0xc5   : > { %p1908_p13 = pnand %p1906_p7, %p2707_p11 }
  0xc7   : > { %p1909_p10 = pneg %p1908_p13 }
  0xc9   : > { %p1914_p4 = pnand %p1912_p2, %p1909_p10 }
  0xcb   : > { %1917 = shalt.err (!%p1914_p4)
}
  0xcc   : > { %s1918_s19 = scalar_lea.vmem %s388_s0, 2048  ;;  %p1926_p3 = scmp.lt.s32.totalorder %s388_s0, %s388_s0 }
  0xcd   : > { %p1919_p5 = scmp.ne.s32.totalorder %s388_s0, %s1918_s19  ;;  %p1927_p12 = scmp.lt.s32.totalorder %s1918_s19, %s1918_s19 }
  0xcf   : > { %p1921_p8 = pnand %p1919_p5, %p2707_p11  ;;  %p1928_p0 = por %p1927_p12, %p1926_p3 }
  0xd1   : > { %p1922_p9 = pneg %p1921_p8 }
  0xd3   : > { %p1929_p6 = pnand %p1928_p0, %p1922_p9 }
  0xd5   : > { %1932 = shalt.err (!%p1929_p6)
}
  0xd6   : > { %1645 = dma.hbm_to_vmem [thread:$0]  (!%p2708_p1), %s2641_s5, 2048, %s388_s0, [#allocation9], %s2115_s13, %s2115_s13, %s2116_s25  }
  0xd7   : > { %s1933_s9 = scalar_lea.hbm %s2643_s7, 2048 }
  0xd8   : > { %p1934_p7 = scmp.ne.s32.totalorder %s2643_s7, %s1933_s9  ;;  %p1940_p10 = scmp.lt.u32.totalorder %s1933_s9, %s2643_s7 }
  0xda   : > { %p1936_p6 = pnand %p1934_p7, %p2707_p11 }
  0xdc   : > { %p1937_p13 = pneg %p1936_p6 }
  0xde   : > { %p1942_p2 = pnand %p1940_p10, %p1937_p13 }
  0xe0   : > { %1945 = shalt.err (!%p1942_p2)
}
  0xe1   : > { %s1946_s0 = scalar_lea.vmem %s2428_s16, 2048  ;;  %p1954_p9 = scmp.lt.s32.totalorder %s2428_s16, %s2428_s16 }
  0xe2   : > { %p1947_p4 = scmp.ne.s32.totalorder %s2428_s16, %s1946_s0  ;;  %p1955_p3 = scmp.lt.s32.totalorder %s1946_s0, %s1946_s0 }
  0xe4   : > { %p1949_p5 = pnand %p1947_p4, %p2707_p11  ;;  %p1956_p12 = por %p1955_p3, %p1954_p9 }
  0xe6   : > { %p1950_p8 = pneg %p1949_p5 }
  0xe8   : > { %p1957_p0 = pnand %p1956_p12, %p1950_p8 }
  0xea   : > { %1960 = shalt.err (!%p1957_p0)
}
  0xeb   : > { %1651 = dma.hbm_to_vmem [thread:$0]  (!%p2708_p1), %s2643_s7, 2048, %s2428_s16, [#allocation12], %s2115_s13, %s2115_s13, %s2116_s25  }
  0xec   : > { %s2119_s27 = smov [#allocation14]   ;;  %s2709_s26 = sshll.u32 %s2105_s24, 7 }
  0xed   : > { %s425_s30 = sshll.u32 %s2119_s27, 4  ;;  %s2482_s29 = scalar_lea.hbm %s2647_s11, %s2709_s26  ;;  %s426_s30 = int_to_ptr.vmem [resolvable:$true] %s425_s30 }
  0xee   : > { %s485_s14 = scalar_lea.vmem [#allocation17], %s2280_s12  ;;  %s1961_s3 = scalar_lea.hbm %s2644_s8, 16 }
  0xef   : > { %s492_s21 = sshll.u32 %s485_s14, 4  ;;  %p1962_p7 = scmp.ne.s32.totalorder %s2644_s8, %s1961_s3  ;;  %s493_s21 = int_to_ptr.vmem [resolvable:$true] %s492_s21 }
  0xf0   : > { %p1968_p10 = scmp.lt.u32.totalorder %s1961_s3, %s2644_s8 }
  0xf1   : > { %p1964_p6 = pnand %p1962_p7, %p2707_p11 }
  0xf3   : > { %p1965_p13 = pneg %p1964_p6 }
  0xf5   : > { %p1970_p2 = pnand %p1968_p10, %p1965_p13 }
  0xf7   : > { %1973 = shalt.err (!%p1970_p2)
}
  0xf8   : > { %s1974_s16 = scalar_lea.vmem %s426_s30, 16  ;;  %s1981_s1 = scalar_lea.vmem %s426_s30, 32 }
  0xf9   : > { %p1975_p4 = scmp.ne.s32.totalorder %s426_s30, %s1974_s16  ;;  %p1982_p9 = scmp.lt.s32.totalorder %s426_s30, %s426_s30 }
  0xfa   : > { %p1983_p3 = scmp.lt.s32.totalorder %s1981_s1, %s1974_s16 }
  0xfb   : > { %p1977_p5 = pnand %p1975_p4, %p2707_p11 }
  0xfc   : > { %p1984_p12 = por %p1983_p3, %p1982_p9 }
  0xfd   : > { %p1978_p8 = pneg %p1977_p5 }
  0xff   : > { %p1985_p0 = pnand %p1984_p12, %p1978_p8 }
 0x101   : > { %1988 = shalt.err (!%p1985_p0)
}
 0x102   : > { %1654 = dma.hbm_to_vmem [thread:$0]  (!%p2708_p1), %s2644_s8, 16, %s426_s30, [#allocation15]  }
 0x103   : > { %s1989_s3 = scalar_lea.hbm %s2482_s29, 128  ;;  %p2710_p7 = scmp.ne.s32.totalorder %s2700_s28, 0 }
 0x104   : > { %p1990_p11 = scmp.ne.s32.totalorder %s2482_s29, %s1989_s3  ;;  %s1994_s9 = scalar_lea.hbm %s2647_s11, 256 }
 0x105   : > { %p1995_p10 = scmp.lt.u32.totalorder %s2482_s29, %s2647_s11  ;;  %p1996_p2 = scmp.lt.u32.totalorder %s1994_s9, %s1989_s3 }
 0x106   : > { %p1992_p6 = pnand %p1990_p11, %p2710_p7  ;;  %p1998_p5 = scmp.lt.u32.totalorder %s1989_s3, %s2482_s29 }
 0x107   : > { %p1997_p4 = por %p1996_p2, %p1995_p10 }
 0x108   : > { %p1993_p13 = pneg %p1992_p6 }
 0x109   : > { %p1999_p8 = por %p1998_p5, %p1997_p4 }
 0x10b   : > { %p2000_p9 = pnand %p1999_p8, %p1993_p13 }
 0x10d   : > { %2003 = shalt.err (!%p2000_p9)
}
 0x10e   : > { %s2004_s30 = scalar_lea.vmem %s493_s21, 128  ;;  %s2120_s14 = smov [#allocation17]  }
 0x10f   : > { %p2005_p1 = scmp.ne.s32.totalorder %s493_s21, %s2004_s30  ;;  %s2009_s0 = sshll.u32 %s2120_s14, 4  ;;  %s2010_s0 = int_to_ptr.vmem [resolvable:$false] %s2009_s0 }
 0x110   : > { %s2011_s19 = scalar_lea.vmem %s2010_s0, 256  ;;  %p2012_p0 = scmp.lt.s32.totalorder %s493_s21, %s2010_s0 }
 0x111   : > { %p2007_p3 = pnand %p2005_p1, %p2710_p7  ;;  %p2013_p11 = scmp.lt.s32.totalorder %s2011_s19, %s2004_s30 }
 0x113   : > { %p2008_p12 = pneg %p2007_p3  ;;  %p2014_p6 = por %p2013_p11, %p2012_p0 }
 0x115   : > { %p2015_p2 = pnand %p2014_p6, %p2008_p12 }
 0x117   : > { %2018 = shalt.err (!%p2015_p2)
}
 0x118   : > { %p2711_p10 = scmp.ne.s32.totalorder %s2699_s23, 0  ;;  %p2712_p13 = scmp.ne.s32.totalorder %s2695_s17, 0 }
 0x119   : > { %s2713_s28 = sld [smem:[#allocation29_spill]] (!%p2712_p13)  ;;  %s2714_s22 = sld [smem:[#allocation27_spill]] (!%p2712_p13) }
 0x11a   : > { %1664 = dma.hbm_to_vmem [thread:$0]  (!%p2711_p10), %s2482_s29, 128, %s493_s21, %s2282_s15  }
 0x11b   : > { %501 = sbr.rel (%p2712_p13) target bundleno = 1270 (0x4f6), region = 68  ;;  %s2715_s13 = sld [smem:[#allocation32_spill]] (!%p2712_p13) }
 0x11f   : > { %s503_s25 = sand.u32 (!%p2712_p13), 1, %s2713_s28   ;;  %s2525_s16 = sand.u32 (!%p2712_p13), 1, %s2714_s22  }
 0x120   : > { %s1292_s1 = sshll.u32 (!%p2712_p13), %s2525_s16, 4  ;;  %s504_s12 = scalar_lea.sflag (!%p2712_p13), [#allocation3], %s503_s25 }
 0x121   : > { %s2528_s27 = scalar_lea.vmem (!%p2712_p13), [#allocation2], %s1292_s1  ;;  %p2716_p7 = scmp.ne.s32.totalorder (!%p2712_p13), %s2715_s13, 0 }
 0x123   : > { %2064 = dma.done.wait (%p2716_p7), %s504_s12, 256  }
 0x124   : > { %2066 = vsyncadd (%p2716_p7), %s504_s12, 4294967040  ;;  %p2717_p4 = scmp.eq.s32.totalorder %s2713_s28, 0 }
 0x126   : > { %2068 = dma.done.wait (%p2717_p4), [#allocation6], 12288   ;;  %p2718_p5 = pmov %p2717_p4 }
 0x127   : > { %p2719_p8 = pmov %p2717_p4 }
 0x128   : > { %2070 = vsyncadd (%p2718_p5), [#allocation6], 4294955008 }
 0x129   : > { %2072 = dma.done.wait (%p2719_p8), [#allocation9], 2064   ;;  %p2720_p9 = pmov %p2717_p4 }
 0x12a   : > { %p2721_p1 = pmov %p2717_p4 }
 0x12b   : > { %2074 = vsyncadd (%p2720_p9), [#allocation9], 4294965232 }
 0x12c   : > { %2076 = dma.done.wait (%p2721_p1), [#allocation12], 2064   ;;  %p2722_p3 = pmov %p2721_p1 }
 0x12d   : > { %p2723_p12 = pmov %p2721_p1 }
 0x12e   : > { %2078 = vsyncadd (%p2722_p3), [#allocation12], 4294965232 }
 0x12f   : > { %2080 = dma.done.wait (%p2723_p12), [#allocation15], 16   ;;  %p2724_p0 = pmov %p2721_p1 }
 0x130   : > { %s2551_s23 = sshll.u32 %s2525_s16, 3 }
 0x131   : > { %2082 = vsyncadd (%p2724_p0), [#allocation15], 4294967280  ;;  %s544_s15 = scalar_lea.vmem [#allocation16], %s2551_s23 }
 0x132   : > { %2084 = dma.done.wait (%p2716_p7), %s504_s12, 256  }
 0x133   : > { %2086 = vsyncadd (%p2716_p7), %s504_s12, 4294967040  ;;  %v617_v0 = vld [vmem:[#allocation5 + $0x8] sm:$0xff]  ;;  %v619_v1 = vld [vmem:[#allocation5 + $0x18] sm:$0xff]  ;;  %p609_p11 = scmp.lt.s32.totalorder %s2713_s28, 1  ;;  %s2725_s3 = sld [smem:[#allocation37_spill]]  ;;  %vm2122_vm0 = vmmov 0  }
 0x134   : > { %v616_v2 = vld [vmem:[#allocation5] sm:$0xff]  ;;  %v1453_v3 = vpack.c.bf16 %v619_v1, %v617_v0  ;;  %v618_v4 = vld [vmem:[#allocation5 + $0x10] sm:$0xff]  ;;  %v621_v5 = vld [vmem:[#allocation5 + $0x28] sm:$0xff]  ;;  %s2726_s20 = sld [smem:[#allocation39_spill]]  ;;  %s553_s30 = scalar_lea.vmem [#allocation17], %s2551_s23 }
 0x135   : > { %v623_v6 = vld [vmem:[#allocation5 + $0x38] sm:$0xff]  ;;  %v1455_v7 = vpack.c.bf16 %v618_v4, %v616_v2  ;;  %v620_v9 = vld [vmem:[#allocation5 + $0x20] sm:$0xff]  ;;  %v622_v10 = vld [vmem:[#allocation5 + $0x30] sm:$0xff]  ;;  %s610_s17 = scalar_select %p609_p11, %s2713_s28, 1 }
 0x136   : > { %v1457_v8 = vpack.c.bf16 %v623_v6, %v621_v5  ;;  %v625_v11 = vld [vmem:[#allocation5 + $0x48] sm:$0xff]  ;;  %1454 = vmatprep.subr.bf16.mxu0 %v1453_v3  ;;  %v627_v12 = vld [vmem:[#allocation5 + $0x58] sm:$0xff]  ;;  %v1459_v13 = vpack.c.bf16 %v622_v10, %v620_v9  ;;  %v624_v15 = vld [vmem:[#allocation5 + $0x40] sm:$0xff]  ;;  %s2727_s14 = sld [smem:[#allocation33_spill]]  ;;  %s1309_s0 = sshll.u32 %s2713_s28, 7 }
 0x137   : > { %1456 = vmatpush1.bf16.msra.mxu0 %v1455_v7  ;;  %v1461_v14 = vpack.c.bf16 %v627_v12, %v625_v11  ;;  %v626_v16 = vld [vmem:[#allocation5 + $0x50] sm:$0xff]  ;;  %v629_v17 = vld [vmem:[#allocation5 + $0x68] sm:$0xff]  ;;  %v631_v18 = vld [vmem:[#allocation5 + $0x78] sm:$0xff]  ;;  %s1313_s18 = sshll.u32 %s610_s17, 4  ;;  %s608_s19 = scalar_lea.vmem [#allocation18], %s2551_s23 }
 0x138   : > { %1458 = vmatprep.subr.bf16.mxu0 %v1457_v8  ;;  %v1463_v19 = vpack.c.bf16 %v626_v16, %v624_v15  ;;  %v1465_v20 = vpack.c.bf16 %v631_v18, %v629_v17  ;;  %v628_v21 = vld [vmem:[#allocation5 + $0x60] sm:$0xff]  ;;  %v630_v22 = vld [vmem:[#allocation5 + $0x70] sm:$0xff]  ;;  %v633_v23 = vld [vmem:[#allocation5 + $0x88] sm:$0xff]  ;;  %s1085_s22 = sshll.u32 %s608_s19, 4  ;;  %s2728_s1 = sld [smem:[#allocation40_spill]]  ;;  %s2594_s22 = int_to_ptr.vmem [resolvable:$true] %s1085_s22 }
 0x139   : > { %v635_v24 = vld [vmem:[#allocation5 + $0x98] sm:$0xff]  ;;  %v1467_v25 = vpack.c.bf16 %v630_v22, %v628_v21  ;;  %v632_v27 = vld [vmem:[#allocation5 + $0x80] sm:$0xff]  ;;  %v634_v28 = vld [vmem:[#allocation5 + $0x90] sm:$0xff]  ;;  %s2124_s28 = smov [#allocation18]  }
 0x13a   : > { %v1469_v26 = vpack.c.bf16 %v635_v24, %v633_v23  ;;  %v637_v29 = vld [vmem:[#allocation5 + $0xa8] sm:$0xff]  ;;  %v639_v30 = vld [vmem:[#allocation5 + $0xb8] sm:$0xff]  ;;  %v1471_v31 = vpack.c.bf16 %v634_v28, %v632_v27  ;;  %v636_v33 = vld [vmem:[#allocation5 + $0xa0] sm:$0xff]  ;;  %s613_s2 = scalar_lea.vmem %s2726_s20, %s1313_s18  ;;  %s2023_s23 = sshll.u32 %s2124_s28, 4  ;;  %s2024_s23 = int_to_ptr.vmem [resolvable:$false] %s2023_s23 }
 0x13b   : > { %1460 = vmatpush1.bf16.msra.mxu0 %v1459_v13  ;;  %v1473_v32 = vpack.c.bf16 %v639_v30, %v637_v29  ;;  %v638_v34 = vld [vmem:[#allocation5 + $0xb0] sm:$0xff]  ;;  %v641_v35 = vld [vmem:[#allocation5 + $0xc8] sm:$0xff]  ;;  %v643_v36 = vld [vmem:[#allocation5 + $0xd8] sm:$0xff]  ;;  %s2025_s17 = scalar_lea.vmem %s2024_s23, 256  ;;  %p2026_p7 = scmp.lt.s32.totalorder %s2594_s22, %s2024_s23 }
 0x13c   : > { %1462 = vmatprep.subr.bf16.mxu0 %v1461_v14  ;;  %v1475_v37 = vpack.c.bf16 %v638_v34, %v636_v33  ;;  %v640_v38 = vld [vmem:[#allocation5 + $0xc0] sm:$0xff]  ;;  %v642_v39 = vld [vmem:[#allocation5 + $0xd0] sm:$0xff]  ;;  %v1477_v40 = vpack.c.bf16 %v643_v36, %v641_v35  ;;  %v645_v41 = vld [vmem:[#allocation5 + $0xe8] sm:$0xff]  ;;  %p2729_p2 = scmp.ne.s32.totalorder %s2727_s14, 0 }
 0x13d   : > { %v647_v42 = vld [vmem:[#allocation5 + $0xf8] sm:$0xff]  ;;  %v785_v44 = vld [vmem:[#allocation7 + $0x80] sm:$0xff]  ;;  %v786_v45 = vld [vmem:[#allocation7 + $0x88] sm:$0xff]  ;;  %v1479_v51 = vpack.c.bf16 %v642_v39, %v640_v38 }
 0x13e   : > { %v615_v43 = vld [vmem:[%s2528_s27 + $0x8] sm:$0xff]  ;;  %v769_v46 = vld [vmem:[#allocation7] sm:$0xff]  ;;  %v1517_v47 = vpack.c.bf16 %v786_v45, %v785_v44  ;;  %v787_v49 = vld [vmem:[#allocation7 + $0x90] sm:$0xff]  ;;  %v1481_v57 = vpack.c.bf16 %v647_v42, %v645_v41  ;;  %s2592_s12 = scalar_lea.hbm %s2728_s1, %s1309_s0 }
 0x13f   : > { %1464 = vmatpush1.bf16.msra.mxu0 %v1463_v19  ;;  %756 = vmatprep.mubr.f32.mxu0 %v615_v43  ;;  %v770_v48 = vld [vmem:[#allocation7 + $0x8] sm:$0xff]  ;;  %v788_v50 = vld [vmem:[#allocation7 + $0x98] sm:$0xff]  ;;  %v771_v54 = vld [vmem:[#allocation7 + $0x10] sm:$0xff] }
 0x140   : > { %1466 = vmatprep.subr.bf16.mxu0 %v1465_v20  ;;  %v1519_v52 = vpack.c.bf16 %v770_v48, %v769_v46  ;;  %v1521_v53 = vpack.c.bf16 %v788_v50, %v787_v49  ;;  %v772_v55 = vld [vmem:[#allocation7 + $0x18] sm:$0xff]  ;;  %v789_v56 = vld [vmem:[#allocation7 + $0xa0] sm:$0xff]  ;;  %v646_v59 = vld [vmem:[#allocation5 + $0xf0] sm:$0xff]  ;;  %1518 = vmatprep.subr.bf16.mxu1 %v1517_v47 }
 0x141   : > { %v644_v58 = vld [vmem:[#allocation5 + $0xe0] sm:$0xff]  ;;  %v790_v60 = vld [vmem:[#allocation7 + $0xa8] sm:$0xff]  ;;  %v651_v62 = vld [vmem:[#allocation5 + $0x118] sm:$0xff]  ;;  %v1523_v63 = vpack.c.bf16 %v772_v55, %v771_v54 }
 0x142   : > { %v649_v61 = vld [vmem:[#allocation5 + $0x108] sm:$0xff]  ;;  %1520 = vmatpush3.bf16.msra.mxu1 %v1519_v52  ;;  %v1525_v0 = vpack.c.bf16 %v790_v60, %v789_v56  ;;  %v773_v1 = vld [vmem:[#allocation7 + $0x20] sm:$0xff]  ;;  %v1483_v3 = vpack.c.bf16 %v646_v59, %v644_v58  ;;  %v791_v4 = vld [vmem:[#allocation7 + $0xb0] sm:$0xff] }
 0x143   : > { %1468 = vmatpush1.bf16.msra.mxu0 %v1467_v25  ;;  %1522 = vmatprep.subr.bf16.mxu1 %v1521_v53  ;;  %v774_v2 = vld [vmem:[#allocation7 + $0x28] sm:$0xff]  ;;  %v792_v5 = vld [vmem:[#allocation7 + $0xb8] sm:$0xff]  ;;  %v1485_v6 = vpack.c.bf16 %v651_v62, %v649_v61  ;;  %v648_v7 = vld [vmem:[#allocation5 + $0x100] sm:$0xff] }
 0x144   : > { %1470 = vmatprep.subr.bf16.mxu0 %v1469_v26  ;;  %v650_v8 = vld [vmem:[#allocation5 + $0x110] sm:$0xff]  ;;  %v653_v9 = vld [vmem:[#allocation5 + $0x128] sm:$0xff]  ;;  %v655_v10 = vld [vmem:[#allocation5 + $0x138] sm:$0xff]  ;;  %v1527_v11 = vpack.c.bf16 %v774_v2, %v773_v1  ;;  %v1529_v12 = vpack.c.bf16 %v792_v5, %v791_v4 }
 0x145   : > { %v775_v13 = vld [vmem:[#allocation7 + $0x30] sm:$0xff]  ;;  %v776_v14 = vld [vmem:[#allocation7 + $0x38] sm:$0xff]  ;;  %v1487_v15 = vpack.c.bf16 %v650_v8, %v648_v7  ;;  %v793_v16 = vld [vmem:[#allocation7 + $0xc0] sm:$0xff]  ;;  %v1489_v18 = vpack.c.bf16 %v655_v10, %v653_v9 }
 0x146   : > { %1524 = vmatpush3.bf16.msra.mxu1 %v1523_v63  ;;  %v794_v17 = vld [vmem:[#allocation7 + $0xc8] sm:$0xff]  ;;  %v652_v19 = vld [vmem:[#allocation5 + $0x120] sm:$0xff]  ;;  %v654_v20 = vld [vmem:[#allocation5 + $0x130] sm:$0xff]  ;;  %v1531_v23 = vpack.c.bf16 %v776_v14, %v775_v13 }
 0x147   : > { %1472 = vmatpush1.bf16.msra.mxu0 %v1471_v31  ;;  %1526 = vmatprep.subr.bf16.mxu1 %v1525_v0  ;;  %v657_v21 = vld [vmem:[#allocation5 + $0x148] sm:$0xff]  ;;  %v659_v22 = vld [vmem:[#allocation5 + $0x158] sm:$0xff]  ;;  %v1533_v24 = vpack.c.bf16 %v794_v17, %v793_v16  ;;  %v777_v25 = vld [vmem:[#allocation7 + $0x40] sm:$0xff]  ;;  %v1491_v27 = vpack.c.bf16 %v654_v20, %v652_v19  ;;  %v682_v19 = vlaneseq }
 0x148   : > { %1474 = vmatprep.subr.bf16.mxu0 %v1473_v32  ;;  %v778_v26 = vld [vmem:[#allocation7 + $0x48] sm:$0xff]  ;;  %v795_v28 = vld [vmem:[#allocation7 + $0xd0] sm:$0xff]  ;;  %v796_v29 = vld [vmem:[#allocation7 + $0xd8] sm:$0xff]  ;;  %v1493_v30 = vpack.c.bf16 %v659_v22, %v657_v21 }
 0x149   : > { %v656_v31 = vld [vmem:[#allocation5 + $0x140] sm:$0xff]  ;;  %v658_v32 = vld [vmem:[#allocation5 + $0x150] sm:$0xff]  ;;  %v661_v33 = vld [vmem:[#allocation5 + $0x168] sm:$0xff]  ;;  %v1535_v35 = vpack.c.bf16 %v778_v26, %v777_v25  ;;  %v1537_v36 = vpack.c.bf16 %v796_v29, %v795_v28  ;;  %v683_v20 = vshrl.u32 %v682_v19, 7 }
 0x14a   : > { %1528 = vmatpush3.bf16.msra.mxu1 %v1527_v11  ;;  %v663_v34 = vld [vmem:[#allocation5 + $0x178] sm:$0xff]  ;;  %v1495_v39 = vpack.c.bf16 %v658_v32, %v656_v31  ;;  %v660_v41 = vld [vmem:[#allocation5 + $0x160] sm:$0xff]  ;;  %v662_v42 = vld [vmem:[#allocation5 + $0x170] sm:$0xff] }
 0x14b   : > { %1476 = vmatpush1.bf16.msra.mxu0 %v1475_v37  ;;  %1530 = vmatprep.subr.bf16.mxu1 %v1529_v12  ;;  %v779_v37 = vld [vmem:[#allocation7 + $0x50] sm:$0xff]  ;;  %v780_v38 = vld [vmem:[#allocation7 + $0x58] sm:$0xff]  ;;  %v665_v43 = vld [vmem:[#allocation5 + $0x188] sm:$0xff]  ;;  %v1499_v46 = vpack.c.bf16 %v662_v42, %v660_v41  ;;  %v684_v21 = vsub.s32 0, %v683_v20 }
 0x14c   : > { %1478 = vmatprep.subr.bf16.mxu0 %v1477_v40  ;;  %v1497_v40 = vpack.c.bf16 %v663_v34, %v661_v33  ;;  %v667_v44 = vld [vmem:[#allocation5 + $0x198] sm:$0xff]  ;;  %v1539_v45 = vpack.c.bf16 %v780_v38, %v779_v37  ;;  %v664_v48 = vld [vmem:[#allocation5 + $0x180] sm:$0xff]  ;;  %v666_v49 = vld [vmem:[#allocation5 + $0x190] sm:$0xff] }
 0x14d   : > { %v1501_v47 = vpack.c.bf16 %v667_v44, %v665_v43  ;;  %v669_v50 = vld [vmem:[#allocation5 + $0x1a8] sm:$0xff]  ;;  %v1503_v52 = vpack.c.bf16 %v666_v49, %v664_v48  ;;  %v668_v54 = vld [vmem:[#allocation5 + $0x1a0] sm:$0xff]  ;;  %v670_v55 = vld [vmem:[#allocation5 + $0x1b0] sm:$0xff] }
 0x14e   : > { %1532 = vmatpush3.bf16.msra.mxu1 %v1531_v23  ;;  %v673_v56 = vld [vmem:[#allocation5 + $0x1c8] sm:$0xff]  ;;  %v1507_v58 = vpack.c.bf16 %v670_v55, %v668_v54  ;;  %v672_v60 = vld [vmem:[#allocation5 + $0x1c0] sm:$0xff]  ;;  %v674_v61 = vld [vmem:[#allocation5 + $0x1d0] sm:$0xff]  ;;  %v688_v23 = vsub.s32 1, %v683_v20 }
 0x14f   : > { %1480 = vmatpush1.bf16.msra.mxu0 %v1479_v51  ;;  %1534 = vmatprep.subr.bf16.mxu1 %v1533_v24  ;;  %v671_v51 = vld [vmem:[#allocation5 + $0x1b8] sm:$0xff]  ;;  %v677_v62 = vld [vmem:[#allocation5 + $0x1e8] sm:$0xff]  ;;  %v1511_v0 = vpack.c.bf16 %v674_v61, %v672_v60  ;;  %v676_v2 = vld [vmem:[#allocation5 + $0x1e0] sm:$0xff]  ;;  %v2123_v60 = vmov 0.0  }
 0x150   : > { %1482 = vmatprep.subr.bf16.mxu0 %v1481_v57  ;;  %v1505_v53 = vpack.c.bf16 %v671_v51, %v669_v50  ;;  %v675_v57 = vld [vmem:[#allocation5 + $0x1d8] sm:$0xff]  ;;  %v614_v5 = vld [vmem:[%s2528_s27] sm:$0xff]  ;;  %v798_v7 = vld [vmem:[#allocation7 + $0xe8] sm:$0xff]  ;;  %s1072_s27 = scalar_lea.sflag [#allocation4], %s2525_s16 }
 0x151   : > { %v1509_v59 = vpack.c.bf16 %v675_v57, %v673_v56  ;;  %v679_v63 = vld [vmem:[#allocation5 + $0x1f8] sm:$0xff]  ;;  %v781_v9 = vld [vmem:[#allocation7 + $0x60] sm:$0xff]  ;;  %v782_v10 = vld [vmem:[#allocation7 + $0x68] sm:$0xff] }
 0x152   : > { %1536 = vmatpush3.bf16.msra.mxu1 %v1535_v35  ;;  %v1513_v1 = vpack.c.bf16 %v679_v63, %v677_v62  ;;  %v1543_v11 = vpack.c.bf16 %v782_v10, %v781_v9  ;;  %v799_v12 = vld [vmem:[#allocation7 + $0xf0] sm:$0xff]  ;;  %v800_v13 = vld [vmem:[#allocation7 + $0xf8] sm:$0xff]  ;;  %v680_v22 = vld [vmem:[%s2725_s3] sm:$0x3] }
 0x153   : > { %1484 = vmatpush1.bf16.msra.mxu0 %v1483_v3  ;;  %1538 = vmatprep.subr.bf16.mxu1 %v1537_v36  ;;  %v678_v3 = vld [vmem:[#allocation5 + $0x1f0] sm:$0xff]  ;;  %v1545_v14 = vpack.c.bf16 %v800_v13, %v799_v12  ;;  %v784_v16 = vld [vmem:[#allocation7 + $0x78] sm:$0xff]  ;;  %v685_v24 = vrot.slane %v680_v22, %v684_v21  ;;  %v689_v25 = vrot.slane %v680_v22, %v688_v23  ;;  %v766_v31 = vld [vmem:[%s613_s2 + $0x8] sm:$0xff] }
 0x154   : > { %1486 = vmatprep.subr.bf16.mxu0 %v1485_v6  ;;  %v1515_v4 = vpack.c.bf16 %v678_v3, %v676_v2  ;;  %v797_v6 = vld [vmem:[#allocation7 + $0xe0] sm:$0xff]  ;;  %v882_v33 = vld [vmem:[#allocation10 + $0x8] sm:$0xff]  ;;  %v891_v51 = vld [vmem:[#allocation10 + $0x50] sm:$0xff] }
 0x155   : > { %v1541_v8 = vpack.c.bf16 %v798_v7, %v797_v6  ;;  %v881_v32 = vld [vmem:[#allocation10] sm:$0xff]  ;;  %v886_v43 = vld [vmem:[#allocation10 + $0x28] sm:$0xff]  ;;  %v895_v57 = vld [vmem:[#allocation10 + $0x70] sm:$0xff] }
 0x156   : > { %1540 = vmatpush3.bf16.msra.mxu1 %v1539_v45  ;;  %v765_v35 = vld [vmem:[%s613_s2] sm:$0xff]  ;;  %v1550_v37 = vpack.c.bf16 %v882_v33, %v881_v32  ;;  %v887_v45 = vld [vmem:[#allocation10 + $0x30] sm:$0xff]  ;;  %v890_v49 = vld [vmem:[#allocation10 + $0x48] sm:$0xff] }
 0x157   : > { %1488 = vmatpush1.bf16.msra.mxu0 %v1487_v15  ;;  %1542 = vmatprep.subr.bf16.mxu1 %v1541_v8  ;;  %v783_v15 = vld [vmem:[#allocation7 + $0x70] sm:$0xff]  ;;  %v885_v42 = vld [vmem:[#allocation10 + $0x20] sm:$0xff]  ;;  %v1305_v10 = vld [vmem:[#allocation8] ss:$0 sm:$0xff] }
 0x158   : > { %1490 = vmatprep.subr.bf16.mxu0 %v1489_v18  ;;  %v1547_v17 = vpack.c.bf16 %v784_v16, %v783_v15  ;;  %v2121_v18 = vmov 0.0|0.0   ;;  %v1556_v44 = vpack.c.bf16 %v886_v43, %v885_v42  ;;  %v889_v48 = vld [vmem:[#allocation10 + $0x40] sm:$0xff]  ;;  %v894_v55 = vld [vmem:[#allocation10 + $0x68] sm:$0xff]  ;;  %v979_v63 = vld [vmem:[#allocation13 + $0x10] sm:$0xff] }
 0x159   : > { %v1562_v50 = vpack.c.bf16 %v890_v49, %v889_v48  ;;  %v893_v54 = vld [vmem:[#allocation10 + $0x60] sm:$0xff]  ;;  %v978_v62 = vld [vmem:[#allocation13 + $0x8] sm:$0xff]  ;;  %v983_v6 = vld [vmem:[#allocation13 + $0x30] sm:$0xff] }
 0x15a   : > { %1544 = vmatpush3.bf16.msra.mxu1 %v1543_v11  ;;  %v1568_v56 = vpack.c.bf16 %v894_v55, %v893_v54  ;;  %v977_v61 = vld [vmem:[#allocation13] sm:$0xff]  ;;  %v984_v7 = vld [vmem:[#allocation13 + $0x38] sm:$0xff]  ;;  %v986_v19 = vld [vmem:[#allocation13 + $0x48] sm:$0xff] }
 0x15b   : > { %1492 = vmatpush1.bf16.msra.mxu0 %v1491_v27  ;;  %1546 = vmatprep.subr.bf16.mxu1 %v1545_v14  ;;  %v981_v3 = vld [vmem:[#allocation13 + $0x20] sm:$0xff]  ;;  %v1583_v8 = vpack.c.bf16 %v984_v7, %v983_v6  ;;  %v987_v21 = vld [vmem:[#allocation13 + $0x50] sm:$0xff]  ;;  %v988_v22 = vld [vmem:[#allocation13 + $0x58] sm:$0xff] }
 0x15c   : > { %1494 = vmatprep.subr.bf16.mxu0 %v1493_v30  ;;  %v879_v14 = vld [vmem:[%s544_s15] sm:$0xff]  ;;  %v1589_v23 = vpack.c.bf16 %v988_v22, %v987_v21  ;;  %s2019_s15 = scalar_lea.vmem %s2594_s22, 128 }
 0x15d   : > { %p2020_p6 = scmp.ne.s32.totalorder %s2594_s22, %s2019_s15  ;;  %p2027_p4 = scmp.lt.s32.totalorder %s2025_s17, %s2019_s15 }
 0x15e   : > { %1548 = vmatpush3.bf16.msra.mxu1 %v1547_v17  ;;  %v985_v17 = vld [vmem:[#allocation13 + $0x40] sm:$0xff] }
 0x15f   : > { %1496 = vmatpush1.bf16.msra.mxu0 %v1495_v39  ;;  %1549 = vmatprep.subr.bf16.mxu1 %v2121_v18  ;;  %v883_v39 = vld [vmem:[#allocation10 + $0x10] sm:$0xff]  ;;  %v1586_v20 = vpack.c.bf16 %v986_v19, %v985_v17  ;;  %p2021_p10 = pnand %p2020_p6, %p2729_p2  ;;  %p2028_p5 = por %p2027_p4, %p2026_p7 }
 0x160   : > { %1498 = vmatprep.subr.bf16.mxu0 %v1497_v40  ;;  %v884_v40 = vld [vmem:[#allocation10 + $0x18] sm:$0xff] }
 0x161   : > { %v1553_v41 = vpack.c.bf16 %v884_v40, %v883_v39  ;;  %p2022_p13 = pneg %p2021_p10 }
 0x163   : > { %1500 = vmatpush1.bf16.msra.mxu0 %v1499_v46  ;;  %v888_v46 = vld [vmem:[#allocation10 + $0x38] sm:$0xff]  ;;  %p2029_p8 = pnand %p2028_p5, %p2022_p13 }
 0x164   : > { %1502 = vmatprep.subr.bf16.mxu0 %v1501_v47  ;;  %v1559_v47 = vpack.c.bf16 %v888_v46, %v887_v45 }
 0x167   : > { %1504 = vmatpush1.bf16.msra.mxu0 %v1503_v52  ;;  %v892_v52 = vld [vmem:[#allocation10 + $0x58] sm:$0xff] }
 0x168   : > { %1506 = vmatprep.subr.bf16.mxu0 %v1505_v53  ;;  %v1565_v53 = vpack.c.bf16 %v892_v52, %v891_v51 }
 0x16b   : > { %1508 = vmatpush1.bf16.msra.mxu0 %v1507_v58  ;;  %v896_v58 = vld [vmem:[#allocation10 + $0x78] sm:$0xff] }
 0x16c   : > { %1510 = vmatprep.subr.bf16.mxu0 %v1509_v59  ;;  %v1571_v59 = vpack.c.bf16 %v896_v58, %v895_v57 }
 0x16f   : > { %1512 = vmatpush1.bf16.msra.mxu0 %v1511_v0  ;;  %v1574_v0 = vpack.c.bf16 %v978_v62, %v977_v61 }
 0x170   : > { %1514 = vmatprep.subr.bf16.mxu0 %v1513_v1  ;;  %v980_v1 = vld [vmem:[#allocation13 + $0x18] sm:$0xff] }
 0x171   : > { %v1577_v2 = vpack.c.bf16 %v980_v1, %v979_v63 }
 0x173   : > { %1516 = vmatpush1.bf16.msra.mxu0 %v1515_v4  ;;  %v982_v4 = vld [vmem:[#allocation13 + $0x28] sm:$0xff] }
 0x174   : > { %1573 = vmatprep.subr.bf16.mxu0 %v2121_v18 }
 0x176   : > { %757 = vmatmul.mubr.f32.vlgmr.msra.gmra.mrb[0].mxu0 %v614_v5  ;;  %v1580_v5 = vpack.c.bf16 %v982_v4, %v981_v3 }
 0x177   : > { %1450 = vmatprep.mubr.msk.f32.mxu0 %vm2122_vm0, %v2123_v60  ;;  %1575 = vmatpush3.bf16.msra.mxu0 %v1574_v0 }
 0x178   : > { %1576 = vmatprep.subr.bf16.mxu0 %v2121_v18 }
 0x17b   : > { %1578 = vmatpush3.bf16.msra.mxu0 %v1577_v2 }
 0x17c   : > { %1579 = vmatprep.subr.bf16.mxu0 %v2121_v18 }
 0x17f   : > { %1581 = vmatpush3.bf16.msra.mxu0 %v1580_v5 }
 0x180   : > { %1582 = vmatprep.subr.bf16.mxu0 %v2121_v18 }
 0x183   : > { %1584 = vmatpush3.bf16.msra.mxu0 %v1583_v8 }
 0x184   : > { %1585 = vmatprep.subr.bf16.mxu0 %v2121_v18 }
 0x187   : > { %1587 = vmatpush3.bf16.msra.mxu0 %v1586_v20 }
 0x188   : > { %1588 = vmatprep.subr.bf16.mxu0 %v2121_v18 }
 0x18b   : > { %1590 = vmatpush3.bf16.msra.mxu0 %v1589_v23 }
 0x18c   : > { %1591 = vmatprep.subr.bf16.mxu0 %v2121_v18 }
 0x249   : > { %v758_v26 = vpop.f32.mrb[0].mxu0 }
 0x24a   : > { %v759_v27 = vadd.f32 %v758_v26, %v685_v24  ;;  %v760_v28 = vpop.f32.mrb[1].mxu0  ;;  %v989_v24 = vld [vmem:[#allocation13 + $0x60] sm:$0xff] }
 0x24b   : > { %v761_v29 = vadd.f32 %v760_v28, %v689_v25  ;;  %v990_v25 = vld [vmem:[#allocation13 + $0x68] sm:$0xff]  ;;  %v992_v28 = vld [vmem:[#allocation13 + $0x78] sm:$0xff] }
 0x24c   : > { %v763_v30 = vmax.f32 %v759_v27, 0.0  ;;  %v1592_v26 = vpack.c.bf16 %v990_v25, %v989_v24  ;;  %v991_v27 = vld [vmem:[#allocation13 + $0x70] sm:$0xff] }
 0x24d   : > { %v764_v34 = vmax.f32 %v761_v29, 0.0  ;;  %v1595_v29 = vpack.c.bf16 %v992_v28, %v991_v27 }
 0x24e   : > { %v767_v38 = vmul.f32 %v765_v35, %v763_v30  ;;  %1593 = vmatpush3.bf16.msra.mxu0 %v1592_v26  ;;  %v1306_v30 = vld [vmem:[#allocation11] ss:$0 sm:$0xff] }
 0x24f   : > { %v768_v36 = vmul.f32 %v766_v31, %v764_v34  ;;  %1594 = vmatprep.subr.bf16.mxu0 %v2121_v18  ;;  %v975_v34 = vld [vmem:[%s553_s30] sm:$0xff] }
 0x251   : > { %872 = vmatprep.mubr.f32.mxu1 %v768_v36 }
 0x252   : > { %873 = vmatmul.mubr.f32.vlgmr.msra.gmra.mrb[0].mxu1 %v767_v38  ;;  %1596 = vmatpush3.bf16.msra.mxu0 %v1595_v29 }
 0x253   : > { %1551 = vmatpush3.bf16.msra.mxu1 %v1550_v37  ;;  %1415 = vmatprep.mubr.msk.f32.mxu1 %vm2122_vm0, %v2123_v60  ;;  %v1307_v37 = vld [vmem:[#allocation14] ss:$0 sm:$0xff] }
 0x254   : > { %1552 = vmatprep.subr.bf16.mxu1 %v2121_v18 }
 0x257   : > { %1554 = vmatpush3.bf16.msra.mxu1 %v1553_v41 }
 0x258   : > { %1555 = vmatprep.subr.bf16.mxu1 %v2121_v18 }
 0x25b   : > { %1557 = vmatpush3.bf16.msra.mxu1 %v1556_v44 }
 0x25c   : > { %1558 = vmatprep.subr.bf16.mxu1 %v2121_v18 }
 0x25f   : > { %1560 = vmatpush3.bf16.msra.mxu1 %v1559_v47 }
 0x260   : > { %1561 = vmatprep.subr.bf16.mxu1 %v2121_v18 }
 0x263   : > { %1563 = vmatpush3.bf16.msra.mxu1 %v1562_v50 }
 0x264   : > { %1564 = vmatprep.subr.bf16.mxu1 %v2121_v18 }
 0x267   : > { %1566 = vmatpush3.bf16.msra.mxu1 %v1565_v53 }
 0x268   : > { %1567 = vmatprep.subr.bf16.mxu1 %v2121_v18 }
 0x26b   : > { %1569 = vmatpush3.bf16.msra.mxu1 %v1568_v56 }
 0x26c   : > { %1570 = vmatprep.subr.bf16.mxu1 %v2121_v18 }
 0x26f   : > { %1572 = vmatpush3.bf16.msra.mxu1 %v1571_v59 }
 0x325   : > { %v1346_v9 = vpop.f32.mrb[0].mxu1 }
 0x326   : > { %v1347_v11 = vpop.f32.mrb[1].mxu1 }
 0x327   : > { %v1348_v12 = vadd.f32 %v1347_v11, %v1346_v9 }
 0x329   : > { %v875_v13 = vadd.f32 %v1348_v12, %v1305_v10 }
 0x32b   : > { %v878_v15 = vmax.f32 %v875_v13, 0.0 }
 0x32d   : > { %v880_v16 = vmul.f32 %v879_v14, %v878_v15 }
 0x32f   : > { %1416 = vmatmul.mubr.f32.vlgmr.msra.gmra.mrb[2].mxu1 %v880_v16 }
 0x402   : > { %v970_v31 = vpop.f32.mrb[2].mxu1 }
 0x403   : > { %v971_v32 = vadd.f32 %v1306_v30, %v970_v31  ;;  %v1417_v33 = vpop.f32.mrb[3].mxu1 }
 0x405   : > { %1731 = vtanh.f32 %v971_v32 }
 0x40f   : > { %v1732_v35 = vpop.eup %1731 }
 0x410   : > { %v976_v36 = vmul.f32 %v1732_v35, %v975_v34 }
 0x412   : > { %1451 = vmatmul.mubr.f32.vlgmr.msra.gmra.mrb[2].mxu0 %v976_v36 }
 0x4e5   : > { %v1066_v38 = vpop.f32.mrb[2].mxu0 }
 0x4e6   : > { %v1067_v39 = vadd.f32 %v1307_v37, %v1066_v38  ;;  %v1452_v18 = vpop.f32.mrb[3].mxu0 }
 0x4e8   : > { %1070 = vst [vmem:[%s608_s19] sm:$0xff] %v1067_v39 }
 0x4e9   : > { %2032 = shalt.err (!%p2029_p8)
}
 0x4ea   : > { %s2033_s16 = scalar_lea.hbm %s2592_s12, 128  ;;  %s2037_s3 = scalar_lea.hbm %s2728_s1, 256 }
 0x4eb   : > { %p2034_p9 = scmp.ne.s32.totalorder %s2592_s12, %s2033_s16  ;;  %p2038_p12 = scmp.lt.u32.totalorder %s2592_s12, %s2728_s1 }
 0x4ec   : > { %p2039_p0 = scmp.lt.u32.totalorder %s2037_s3, %s2033_s16  ;;  %p2041_p6 = scmp.lt.u32.totalorder %s2033_s16, %s2592_s12 }
 0x4ed   : > { %p2035_p1 = pnand %p2034_p9, %p2729_p2 }
 0x4ee   : > { %p2040_p11 = por %p2039_p0, %p2038_p12 }
 0x4ef   : > { %p2036_p3 = pneg %p2035_p1 }
 0x4f0   : > { %p2042_p10 = por %p2041_p6, %p2040_p11 }
 0x4f2   : > { %p2043_p13 = pnand %p2042_p10, %p2036_p3 }
 0x4f4   : > { %2046 = shalt.err (!%p2043_p13)
}
 0x4f5   : > { %1631 = dma.vmem_to_hbm [thread:$0]  (%p2729_p2), %s2594_s22, 128, %s2592_s12, %s1072_s27  }
 0x4f6 PF: > { %s2730_s9 = sld [smem:[#allocation26_spill]]  ;;  %s2731_s20 = sld [smem:[#allocation34_spill]] }
 0x4f7   : > { %p2733_p4 = scmp.ge.s32.totalorder %s2105_s24, 2 }
 0x4fc   : > { %s1097_s2 = sand.u32 1, %s2730_s9   ;;  %p2732_p7 = scmp.ne.s32.totalorder %s2731_s20, 0 }
 0x4fd   : > { %s1098_s30 = scalar_lea.sflag [#allocation4], %s1097_s2 }
 0x4fe   : > { %p1666_p5 = pnand %p2733_p4, %p2732_p7 }
 0x500   : > { %2088 = dma.done.wait (!%p1666_p5), %s1098_s30, 128  }
 0x501   : > { %2090 = vsyncadd (!%p1666_p5), %s1098_s30, 4294967168  ;;  %s2734_s24 = sld [smem:[#allocation30_spill]]  ;;  %s2735_s21 = sld [smem:[#allocation27_spill]] }
 0x502   : > { %s2736_s22 = sld [smem:[#allocation28_spill]]  ;;  %s2737_s23 = sld [smem:[#allocation31_spill]] }
 0x507   : > { %p29_p8 = scmp.ge.s32.totalorder %s2734_s24, 4  }
 0x509   :  { %31 = sbr.rel (!%p29_p8) target bundleno = 16 (0x10), region = 166 }
 0x510   :  { %1103 = vsyncpa [#allocation3], 1 }
 0x511   :  { %1105 = vsyncpa [#allocation3 + $0x1], 1 }
 0x512   :  { %1106 = vsyncpa [#allocation6], 1 }
 0x513   :  { %1107 = vsyncpa [#allocation9], 1 }
 0x514   :  { %1108 = vsyncpa [#allocation12], 1 }
 0x515   :  { %1109 = vsyncpa [#allocation15], 1 }
 0x516   :  { %1110 = vsyncpa [#allocation4], 1 }
 0x517   :  { %1112 = vsyncpa [#allocation4 + $0x1], 1 }

</bundles_post_ra>
